<compile_context>
chip_gen: v7x
topology: tpu7x:2x2x1
jax: 0.10.0
libtpu: 0.0.40
codegen_flags: <defaults>
</compile_context>

<pallas_src>
import functools
import math

import numpy as np

import jax
import jax.numpy as jnp
from jax.experimental import pallas as pl
from jax.experimental.pallas import tpu as pltpu

FP32 = jnp.float32


# ---------------------------------------------------------------------------
# Pallas kernel: pad-mask select over a lane-dense (TB, S*E) output slab.
# ---------------------------------------------------------------------------
def pos_emb_kernel(tok_ref, emb_ref, out_ref, *, padding_idx, embedding_dim):
    # tok_ref: (TB, S)     int32   -- token tile for this batch block
    # emb_ref: (1,  S*E)   float32 -- flattened sinusoidal rows (resident across grid)
    # out_ref: (TB, S*E)   float32 -- lane-dense output tile
    tb, s = tok_ref.shape
    tok = tok_ref[...]                                                  # (TB, S)
    # Expand each token E times along the lane axis so compare/select/store are
    # all lane-dense (VPU/XLU work with slack; the store is the binding slot).
    tok_e = jnp.broadcast_to(tok[:, :, None], (tb, s, embedding_dim))
    tok_e = tok_e.reshape(tb, s * embedding_dim)                        # (TB, S*E)
    out_ref[...] = jnp.where(tok_e != padding_idx, emb_ref[...], jnp.float32(0.0))


# ---------------------------------------------------------------------------
# Host-side cached sinusoidal rows (analogue of the module's self.weights cache).
# Built with numpy so it constant-folds under jit instead of re-running as XLA ops.
# ---------------------------------------------------------------------------
@functools.lru_cache(maxsize=None)
def _sinusoidal_rows_flat(seq_len, embedding_dim, padding_idx):
    """Rows padding_idx+1 .. padding_idx+seq_len, flattened to (1, seq_len*E)."""
    half = embedding_dim // 2
    denom = max(half - 1, 1)                       # guard embedding_dim == 2
    freq = np.exp(np.arange(half, dtype=np.float32) * -(math.log(10000.0) / denom))
    pos = np.arange(padding_idx + 1, padding_idx + 1 + seq_len, dtype=np.float32)
    ang = pos[:, None] * freq[None, :]                                  # (S, half)
    emb = np.concatenate([np.sin(ang), np.cos(ang)], axis=1).astype(np.float32)
    if embedding_dim % 2 == 1:
        emb = np.concatenate([emb, np.zeros((seq_len, 1), np.float32)], axis=1)
    return jnp.asarray(emb.reshape(1, seq_len * embedding_dim), dtype=FP32)


def _pick_batch_tile(bsz, out_row_bytes):
    """Batch tile: full batch when tiny, otherwise a multiple of 8 sized so a
    double-buffered output tile stays well inside v7x's scoped VMEM."""
    if bsz <= 8:
        return bsz
    budget = 8 * 1024 * 1024                       # per-buffer output-tile budget
    return min(bsz, max(8, (budget // out_row_bytes) // 8 * 8))


# ---------------------------------------------------------------------------
# Public wrapper: matches SinusoidalPositionalEmbedding.forward
# ---------------------------------------------------------------------------
@functools.partial(jax.jit, static_argnames=("embedding_dim", "padding_idx"))
def sinusoidal_positional_embedding(tokens, embedding_dim, padding_idx=0):
    """tokens: (bsz, seq_len) integer array -> (bsz, seq_len, embedding_dim) float32."""
    bsz, seq_len = tokens.shape
    flat = seq_len * embedding_dim
    emb_flat = _sinusoidal_rows_flat(seq_len, embedding_dim, padding_idx)  # (1, S*E)

    tb = _pick_batch_tile(bsz, flat * 4)
    grid = (pl.cdiv(bsz, tb),)

    kernel = functools.partial(
        pos_emb_kernel, padding_idx=padding_idx, embedding_dim=embedding_dim)

    out_flat = pl.pallas_call(
        kernel,
        out_shape=jax.ShapeDtypeStruct((bsz, flat), FP32),
        grid=grid,
        in_specs=[
            pl.BlockSpec((tb, seq_len), lambda i: (i, 0)),   # token tile per batch block
            pl.BlockSpec((1, flat), lambda i: (0, 0)),       # table resident across grid
        ],
        out_specs=pl.BlockSpec((tb, flat), lambda i: (i, 0)),
        compiler_params=pltpu.CompilerParams(
            dimension_semantics=("parallel",)),
    )(tokens.astype(jnp.int32), emb_flat)

    return out_flat.reshape(bsz, seq_len, embedding_dim)


# ---------------------------------------------------------------------------
# Pure-JAX reference (direct transcription of the PyTorch module, left_pad=0)
# ---------------------------------------------------------------------------
def reference_forward(tokens, embedding_dim, padding_idx=0):
    bsz, seq_len = tokens.shape
    max_pos = padding_idx + 1 + seq_len
    half = embedding_dim // 2
    denom = max(half - 1, 1)
    freq = jnp.exp(jnp.arange(half, dtype=FP32) * -(math.log(10000.0) / denom))
    ang = jnp.arange(max_pos, dtype=FP32)[:, None] * freq[None, :]
    table = jnp.concatenate([jnp.sin(ang), jnp.cos(ang)], axis=1)
    if embedding_dim % 2 == 1:
        table = jnp.concatenate([table, jnp.zeros((max_pos, 1), FP32)], axis=1)
    table = table.at[padding_idx].set(0.0)
    # make_positions with left_pad=False: arange positions, pad slots keep padding_idx
    arange_pos = jnp.arange(padding_idx + 1, padding_idx + 1 + seq_len, dtype=jnp.int32)
    positions = jnp.where(tokens != padding_idx, arange_pos[None, :], padding_idx)
    return table[positions]                                             # (bsz, seq_len, E)


if __name__ == "__main__":
    B, S, E = 2, 8, 32
    PADDING_IDX = 0

    key = jax.random.PRNGKey(0)
    # PyTorch-convention input: (bsz, seq_len) token ids, padding_idx == 0
    tokens = jax.random.randint(key, (B, S), 1, 1000, dtype=jnp.int32)
    # right-pad the second sequence with padding_idx tokens
    lengths = jnp.array([S, S - 3], dtype=jnp.int32)
    valid = jnp.arange(S, dtype=jnp.int32)[None, :] < lengths[:, None]
    tokens = jnp.where(valid, tokens, PADDING_IDX)

    out = sinusoidal_positional_embedding(tokens, E, PADDING_IDX)
    out = jax.block_until_ready(out)
    assert out.shape == (B, S, E)

    ref = reference_forward(tokens, E, PADDING_IDX)
    max_err = float(jnp.max(jnp.abs(out - ref)))
    assert jnp.allclose(out, ref, atol=1e-5), f"max abs err = {max_err}"
    print("KERNEL_OK")
</pallas_src>

<mosaic_0001>
module attributes {stable_mosaic.version = 11 : i64} {
  func.func @pos_emb_kernel(%arg0: i32, %arg1: memref<2x8xi32, #tpu.memory_space<vmem>>, %arg2: memref<1x256xf32, #tpu.memory_space<vmem>>, %arg3: memref<2x256xf32, #tpu.memory_space<vmem>>) attributes {dimension_semantics = [#tpu.dimension_semantics<parallel>], iteration_bounds = array<i64: 1>, scalar_prefetch = 0 : i64, scratch_operands = 0 : i64, tpu.core_type = #tpu.core_type<tc>, window_params = [{transform_indices = @transform_0, window_bounds = array<i64: 2, 8>}, {pipeline_mode = #tpu.pipeline_mode<synchronous>, transform_indices = @transform_1, window_bounds = array<i64: 1, 256>}, {transform_indices = @transform_2, window_bounds = array<i64: 2, 256>}]} {
    %c0 = arith.constant 0 : index
    %c0_0 = arith.constant 0 : index
    %0 = vector.load %arg1[%c0, %c0_0] : memref<2x8xi32, #tpu.memory_space<vmem>>, vector<2x8xi32>
    %1 = vector.shape_cast %0 : vector<2x8xi32> to vector<2x8x1xi32>
    %2 = vector.shape_cast %1 : vector<2x8x1xi32> to vector<2x8x1xi32>
    %3 = vector.broadcast %2 : vector<2x8x1xi32> to vector<2x8x32xi32>
    %4 = vector.shape_cast %3 : vector<2x8x32xi32> to vector<2x256xi32>
    %c0_i32 = arith.constant 0 : i32
    %5 = vector.broadcast %c0_i32 : i32 to vector<2x256xi32>
    %6 = arith.cmpi ne, %4, %5 : vector<2x256xi32>
    %c0_1 = arith.constant 0 : index
    %c0_2 = arith.constant 0 : index
    %7 = vector.load %arg2[%c0_1, %c0_2] : memref<1x256xf32, #tpu.memory_space<vmem>>, vector<1x256xf32>
    %cst = arith.constant 0.000000e+00 : f32
    %8 = vector.shape_cast %7 : vector<1x256xf32> to vector<1x256xf32>
    %9 = vector.broadcast %8 : vector<1x256xf32> to vector<2x256xf32>
    %10 = vector.broadcast %cst : f32 to vector<2x256xf32>
    %11 = arith.select %6, %9, %10 : vector<2x256xi1>, vector<2x256xf32>
    %c0_3 = arith.constant 0 : index
    %c0_4 = arith.constant 0 : index
    %12 = vector.load %arg3[%c0_3, %c0_4] : memref<2x256xf32, #tpu.memory_space<vmem>>, vector<2x256xf32>
    tpu.vector_store %arg3[%c0_3, %c0_4], %11 {strides = array<i32>} : memref<2x256xf32, #tpu.memory_space<vmem>>, vector<2x256xf32>,
    return
  }
  func.func @transform_0(%arg0: i32) -> (i32, i32) {
    %c0_i32 = arith.constant 0 : i32
    %c0_i32_0 = arith.constant 0 : i32
    return %arg0, %c0_i32 : i32, i32
  }
  func.func @transform_1(%arg0: i32) -> (i32, i32) {
    %c0_i32 = arith.constant 0 : i32
    %c0_i32_0 = arith.constant 0 : i32
    %c0_i32_1 = arith.constant 0 : i32
    return %c0_i32, %c0_i32_0 : i32, i32
  }
  func.func @transform_2(%arg0: i32) -> (i32, i32) {
    %c0_i32 = arith.constant 0 : i32
    %c0_i32_0 = arith.constant 0 : i32
    return %arg0, %c0_i32 : i32, i32
  }
}

</mosaic_0001>

<bundles_post_ra>
// kernel: sinusoidal_positional_embedding.1
= control target key start
LH: loop header
LB: loop body
LE: loop exit
PB: predicated region body
PF: predicated region fallthrough
CT: control target
= control target key end

     0   :  { %7 = vsyncpa [#allocation3], 0  ;;  %s190_s9 = smov [#allocation2]   ;;  %s230_s0 = inlined_call_operand.hbm [shape: s32[2,8], index: 0, kind: input, shape index: {}]   ;;  %s231_s1 = inlined_call_operand.vmem [shape: f32[1,256], index: 1, kind: input, shape index: {}]   ;;  %s232_s2 = inlined_call_operand.vmem [shape: f32[2,256], index: 2, kind: output, shape index: {}]  }
   0x1   :  { %s14_s10 = sshll.u32 %s190_s9, 4  ;;  %s166_s13 = scalar_lea.hbm %s230_s0, 32  ;;  %s15_s10 = int_to_ptr.vmem [resolvable:$true] %s14_s10 }
   0x2   :  { %p167_p0 = scmp.ne.s32.totalorder %s230_s0, %s166_s13  ;;  %p170_p1 = scmp.lt.u32.totalorder %s166_s13, %s230_s0 }
   0x4   :  { %p172_p2 = pnand %p170_p1, %p167_p0 }
   0x6   :  { %175 = shalt.err (!%p172_p2)
}
   0x7   :  { %s176_s18 = scalar_lea.vmem %s15_s10, 32  ;;  %p181_p4 = scmp.lt.s32.totalorder %s15_s10, %s15_s10 }
   0x8   :  { %p177_p3 = scmp.ne.s32.totalorder %s15_s10, %s176_s18  ;;  %p182_p5 = scmp.lt.s32.totalorder %s176_s18, %s176_s18 }
   0xa   :  { %p183_p6 = por %p182_p5, %p181_p4 }
   0xc   :  { %p184_p7 = pnand %p183_p6, %p177_p3 }
   0xe   :  { %187 = shalt.err (!%p184_p7)
}
   0xf   :  { %17 = dma.hbm_to_vmem [thread:$0]  %s230_s0, 32, %s15_s10, [#allocation3]  }
  0x10   :  { %188 = dma.done.wait [#allocation3], 32  }
  0x11   :  { %189 = vsyncadd [#allocation3], 4294967264  ;;  %v24_v0 = vlaneseq  ;;  %v23_v4 = vld [vmem:[#allocation2] sm:$0x3]  ;;  %v191_v7 = vmov 1983009808  }
  0x12   :  { %v40_v8 = vunpack.c.l.s4 %v191_v7  ;;  %v192_v9 = vmov 1934713408   ;;  %v193_v17 = vmov 0   ;;  %s194_s0 = smov 64   ;;  %s195_s21 = smov 32   ;;  %vm116_vm0 = vcmask 261120  }
  0x13   :  { %v25_v1 = vshrl.u32 %v24_v0, 7  ;;  %v71_v10 = vunpack.c.l.s4 %v192_v9  ;;  %s196_s22 = smov 96   ;;  %vm118_vm1 = vcmask 523264   ;;  %vm120_vm2 = vcmask 785408   ;;  %v127_v42 = vld [vmem:[%s231_s1] sm:$0x3] }
  0x14   :  { %v41_v11 = vunpack.c.0.s8 %v40_v8 }
  0x15   :  { %v26_v2 = vsub.s32 0, %v25_v1  ;;  %v33_v3 = vsub.s32 1, %v25_v1  ;;  %v72_v13 = vunpack.c.0.s8 %v71_v10 }
  0x16   :  { %v44_v14 = vsub.s32 %v41_v11, %v25_v1 }
  0x17   :  { %v27_v5 = vrot.slane %v23_v4, %v26_v2  ;;  %v34_v6 = vrot.slane %v23_v4, %v33_v3  ;;  %v75_v16 = vsub.s32 %v72_v13, %v25_v1  ;;  %v132_v46 = vrot.slane %v127_v42, %v26_v2 }
  0x18   :  { %v136_v47 = vrot.slane %v127_v42, %v33_v3 }
  0x19   :  { %29 = vbcast.lane.b32.xlu0 %v27_v5, 256 }
  0x1d   :  { %36 = vbcast.lane.b32.xlu0 %v34_v6, 256 }
  0x8b   :  { %v30_v12 = vpop.permute.xlu0 %29 }
  0x8c   :  { %v38_v18 = vcombine.high %v30_v12, %v193_v17  ;;  %v45_v19 = vrot.slane %v30_v12, %v44_v14 }
  0x8e   :  { %v52_v25 = vrot.slane %v38_v18, %v44_v14 }
  0x8f   :  { %v37_v15 = vpop.permute.xlu0 %36 }
  0x90   :  { %v53_v20 = vcombine.high %v37_v15, %v193_v17  ;;  %v60_v21 = vrot.slane %v37_v15, %v44_v14 }
  0x92   :  { %v67_v22 = vrot.slane %v53_v20, %v44_v14  ;;  %v68_v23 = vcombine.low %v45_v19, %v60_v21  ;;  %v69_v24 = vcombine.high %v45_v19, %v60_v21 }
  0x94   :  { %v83_v26 = vrot.slane %v69_v24, %v75_v16  ;;  %v76_v27 = vrot.slane %v68_v23, %v75_v16  ;;  %v84_v28 = vcombine.low %v52_v25, %v67_v22  ;;  %v85_v29 = vcombine.high %v52_v25, %v67_v22 }
  0x96   :  { %106 = vrot.lane.b32.xlu0 %v83_v26, %s194_s0  ;;  %v100_v30 = vcombine.high %v76_v27, %v193_v17  ;;  %v101_v31 = vcombine.high %v83_v26, %v193_v17  ;;  %v99_v32 = vrot.slane %v85_v29, %v75_v16  ;;  %v92_v33 = vrot.slane %v84_v28, %v75_v16 }
  0x98   :  { %104 = vrot.lane.b32.xlu1 %v100_v30, %s195_s21  ;;  %v102_v34 = vcombine.high %v92_v33, %v193_v17  ;;  %v103_v35 = vcombine.high %v99_v32, %v193_v17 }
  0x9a   :  { %108 = vrot.lane.b32.xlu0 %v101_v31, %s196_s22 }
  0x9c   :  { %112 = vrot.lane.b32.xlu1 %v99_v32, %s194_s0 }
  0xa0   :  { %110 = vrot.lane.b32.xlu1 %v102_v34, %s195_s21 }
  0xa4   :  { %114 = vrot.lane.b32.xlu1 %v103_v35, %s196_s22 }
 0x108   :  { %v107_v36 = vpop.permute.xlu0 %106 }
 0x10a   :  { %v105_v37 = vpop.permute.xlu1 %104 }
 0x10b   :  { %v117_v38 = vsel %vm116_vm0, %v76_v27, %v105_v37 }
 0x10c   :  { %v109_v40 = vpop.permute.xlu0 %108  ;;  %v119_v41 = vsel %vm118_vm1, %v117_v38, %v107_v36 }
 0x10d   :  { %v121_v44 = vsel %vm120_vm2, %v119_v41, %v109_v40 }
 0x10e   :  { %v113_v39 = vpop.permute.xlu1 %112  ;;  %vm125_vm3 = vcmp.ne.s32.totalorder %v121_v44, 0 }
 0x10f   :  { %v139_v51 = vsel %vm125_vm3, %v132_v46, 0.0 }
 0x112   :  { %v111_v43 = vpop.permute.xlu1 %110 }
 0x113   :  { %v122_v45 = vsel %vm116_vm0, %v92_v33, %v111_v43 }
 0x114   :  { %v123_v48 = vsel %vm118_vm1, %v122_v45, %v113_v39 }
 0x116   :  { %v115_v49 = vpop.permute.xlu1 %114 }
 0x117   :  { %v124_v50 = vsel %vm120_vm2, %v123_v48, %v115_v49 }
 0x118   :  { %vm126_vm4 = vcmp.ne.s32.totalorder %v124_v50, 0 }
 0x119   :  { %v140_v52 = vsel %vm126_vm4, %v136_v47, 0.0 }
 0x11a   :  { %v143_v53 = vcombine.low %v139_v51, %v140_v52 }
 0x11c   :  { %158 = vst.sshfl [vmem:[%s232_s2] sm:$0x33 pattern:$0x76325410] %v143_v53 }
 0x11d   :  { %157 = vsyncpa [#allocation3], 1 }

</bundles_post_ra>
